<compile_context>
chip_gen: v7x
topology: tpu7x:2x2x1
jax: 0.10.0
libtpu: 0.0.40
codegen_flags: <defaults>
</compile_context>

<pallas_src>
import jax
import jax.numpy as jnp
from jax.experimental import pallas as pl
from jax.experimental.pallas import tpu as pltpu

EPS = 1e-5  # nn.LayerNorm default eps


def prenorm_kernel(x_ref, gamma_ref, beta_ref, w_ref, b_ref, o_ref):
    # x_ref: (TM, D) row tile in VMEM.
    x = x_ref[...].astype(jnp.float32)

    # LayerNorm over the last dim (biased variance, matching torch.nn.LayerNorm).
    # Centered two-pass form for numerical robustness; reductions go to the XLU
    # and are cheap relative to the D x D matmul below.
    mean = jnp.mean(x, axis=-1, keepdims=True)
    centered = x - mean
    var = jnp.mean(centered * centered, axis=-1, keepdims=True)
    x_hat = centered * jax.lax.rsqrt(var + EPS)     # rsqrt -> EUP slot (free-ish)
    y = x_hat * gamma_ref[...].astype(jnp.float32) + beta_ref[...].astype(jnp.float32)

    # fn = Linear(dim, dim): y @ W + b.
    # Cast the LHS to W's dtype so a bf16 weight hits the MXU bf16 fast path;
    # accumulation stays in f32 via preferred_element_type.
    out = jnp.dot(y.astype(w_ref.dtype), w_ref[...],
                  preferred_element_type=jnp.float32)
    out = out + b_ref[...].astype(jnp.float32)
    o_ref[...] = out.astype(o_ref.dtype)


def _pick_tm(M, D, x_dtype, w_dtype):
    """Largest 8-aligned row tile that fits a conservative VMEM budget."""
    x_bytes = jnp.dtype(x_dtype).itemsize
    w_bytes = jnp.dtype(w_dtype).itemsize
    budget = 24 * 1024 * 1024  # conservative: leaves headroom even on v7x (64 MiB VMEM)
    # Resident across grid steps: W (count double-buffered to be safe) + row params.
    resident = 2 * D * D * w_bytes + 8 * D * max(x_bytes, 4)
    avail = max(budget - resident, 1 << 20)
    # Per tile row: double-buffered x + out tiles, plus ~3 f32 intermediates.
    per_row = D * (4 * x_bytes + 12)
    tm = int(max(8, min(1024, avail // per_row)))
    tm -= tm % 8                                   # sublane (8) alignment
    tm = min(tm, ((M + 7) // 8) * 8)               # never exceed (padded) row count
    return max(tm, 8)


def prenorm_linear(x, gamma, beta, w, b, *, tm=None):
    """x: (B, S, D). gamma/beta: (D,). w: (D, D) acting as y @ w. b: (D,)."""
    B, S, D = x.shape
    M = B * S
    x2 = x.reshape(M, D)
    gamma2 = gamma.reshape(1, D)
    beta2 = beta.reshape(1, D)
    b2 = b.reshape(1, D)

    if tm is None:
        tm = _pick_tm(M, D, x.dtype, w.dtype)
    grid = (pl.cdiv(M, tm),)

    cost = pl.CostEstimate(
        flops=2 * M * D * D + 6 * M * D,
        transcendentals=M,  # one rsqrt per row
        bytes_accessed=(2 * M * D * x.dtype.itemsize
                        + D * D * w.dtype.itemsize
                        + 3 * D * gamma.dtype.itemsize),
    )

    out2 = pl.pallas_call(
        prenorm_kernel,
        out_shape=jax.ShapeDtypeStruct((M, D), x.dtype),
        grid_spec=pltpu.PrefetchScalarGridSpec(
            num_scalar_prefetch=0,
            grid=grid,
            in_specs=[
                pl.BlockSpec((tm, D), lambda i: (i, 0)),   # x row tile (pipelined)
                pl.BlockSpec((1, D), lambda i: (0, 0)),    # gamma (resident)
                pl.BlockSpec((1, D), lambda i: (0, 0)),    # beta  (resident)
                pl.BlockSpec((D, D), lambda i: (0, 0)),    # W     (resident)
                pl.BlockSpec((1, D), lambda i: (0, 0)),    # b     (resident)
            ],
            out_specs=pl.BlockSpec((tm, D), lambda i: (i, 0)),
        ),
        compiler_params=pltpu.CompilerParams(
            dimension_semantics=("parallel",),
            vmem_limit_bytes=48 * 1024 * 1024,
        ),
        cost_estimate=cost,
    )(x2, gamma2, beta2, w, b2)

    return out2.reshape(B, S, D)


def _reference(x, gamma, beta, w, b):
    x32 = x.astype(jnp.float32)
    mean = jnp.mean(x32, axis=-1, keepdims=True)
    var = jnp.mean((x32 - mean) ** 2, axis=-1, keepdims=True)
    xn = (x32 - mean) / jnp.sqrt(var + EPS)
    y = xn * gamma.astype(jnp.float32) + beta.astype(jnp.float32)
    out = y @ w.astype(jnp.float32) + b.astype(jnp.float32)
    return out.astype(x.dtype)


if __name__ == "__main__":
    key = jax.random.PRNGKey(0)
    kx1, kx2, kx3, kw, kw2 = jax.random.split(key, 5)

    # --- test 1: small PreNorm shape (B=2, S=8, D=32), multiple row tiles ---
    B, S, D = 2, 8, 32
    x = jax.random.normal(kx1, (B, S, D), dtype=jnp.float32)
    gamma = jnp.ones((D,), dtype=jnp.float32)      # LayerNorm weight default
    beta = jnp.zeros((D,), dtype=jnp.float32)      # LayerNorm bias default
    w = jax.random.normal(kw, (D, D), dtype=jnp.float32) * 0.02  # fn = Linear
    b = jnp.zeros((D,), dtype=jnp.float32)

    out = jax.block_until_ready(prenorm_linear(x, gamma, beta, w, b, tm=8))
    ref = _reference(x, gamma, beta, w, b)
    assert jnp.allclose(out, ref, atol=1e-4, rtol=1e-4)

    # --- test 2: ragged row count (M=60 not a multiple of TM=16): partial last
    # block + explicit tile override ---
    B2, S2 = 3, 20
    x2 = jax.random.normal(kx2, (B2, S2, D), dtype=jnp.float32)
    out2 = jax.block_until_ready(prenorm_linear(x2, gamma, beta, w, b, tm=16))
    ref2 = _reference(x2, gamma, beta, w, b)
    assert jnp.allclose(out2, ref2, atol=1e-4, rtol=1e-4)

    # --- test 3: lane-aligned D=128 with non-trivial gamma/beta and auto tile
    # selection (exercises the lane-dense store / MXU-native path) ---
    B3, S3, D3 = 2, 16, 128
    x3 = jax.random.normal(kx3, (B3, S3, D3), dtype=jnp.float32)
    gamma3 = 1.0 + 0.1 * jax.random.normal(kw2, (D3,), dtype=jnp.float32)
    beta3 = 0.05 * jnp.ones((D3,), dtype=jnp.float32)
    w3 = jax.random.normal(kw2, (D3, D3), dtype=jnp.float32) * 0.02
    b3 = 0.01 * jnp.ones((D3,), dtype=jnp.float32)
    out3 = jax.block_until_ready(prenorm_linear(x3, gamma3, beta3, w3, b3))
    ref3 = _reference(x3, gamma3, beta3, w3, b3)
    assert jnp.allclose(out3, ref3, atol=1e-4, rtol=1e-4)

    print("KERNEL_OK")
</pallas_src>

<mosaic_0001>
module attributes {stable_mosaic.version = 11 : i64} {
  func.func @prenorm_kernel(%arg0: i32, %arg1: memref<8x32xf32, #tpu.memory_space<vmem>>, %arg2: memref<1x32xf32, #tpu.memory_space<vmem>>, %arg3: memref<1x32xf32, #tpu.memory_space<vmem>>, %arg4: memref<32x32xf32, #tpu.memory_space<vmem>>, %arg5: memref<1x32xf32, #tpu.memory_space<vmem>>, %arg6: memref<8x32xf32, #tpu.memory_space<vmem>>) attributes {dimension_semantics = [#tpu.dimension_semantics<parallel>], iteration_bounds = array<i64: 2>, scalar_prefetch = 0 : i64, scratch_operands = 0 : i64, tpu.core_type = #tpu.core_type<tc>, window_params = [{transform_indices = @transform_0, window_bounds = array<i64: 8, 32>}, {pipeline_mode = #tpu.pipeline_mode<synchronous>, transform_indices = @transform_1, window_bounds = array<i64: 1, 32>}, {pipeline_mode = #tpu.pipeline_mode<synchronous>, transform_indices = @transform_2, window_bounds = array<i64: 1, 32>}, {pipeline_mode = #tpu.pipeline_mode<synchronous>, transform_indices = @transform_3, window_bounds = array<i64: 32, 32>}, {pipeline_mode = #tpu.pipeline_mode<synchronous>, transform_indices = @transform_4, window_bounds = array<i64: 1, 32>}, {transform_indices = @transform_5, window_bounds = array<i64: 8, 32>}]} {
    %c0 = arith.constant 0 : index
    %c0_0 = arith.constant 0 : index
    %0 = vector.load %arg1[%c0, %c0_0] : memref<8x32xf32, #tpu.memory_space<vmem>>, vector<8x32xf32>
    %cst = arith.constant dense<0.000000e+00> : vector<8xf32>
    %1 = vector.multi_reduction <add>, %0, %cst [1] : vector<8x32xf32> to vector<8xf32>
    %2 = vector.shape_cast %1 : vector<8xf32> to vector<8x1xf32>
    %cst_1 = arith.constant 3.200000e+01 : f32
    %3 = vector.broadcast %cst_1 : f32 to vector<8x1xf32>
    %4 = arith.divf %2, %3 : vector<8x1xf32>
    %5 = vector.broadcast %4 : vector<8x1xf32> to vector<8x32xf32>
    %6 = arith.subf %0, %5 : vector<8x32xf32>
    %7 = arith.mulf %6, %6 : vector<8x32xf32>
    %cst_2 = arith.constant dense<0.000000e+00> : vector<8xf32>
    %8 = vector.multi_reduction <add>, %7, %cst_2 [1] : vector<8x32xf32> to vector<8xf32>
    %9 = vector.shape_cast %8 : vector<8xf32> to vector<8x1xf32>
    %cst_3 = arith.constant 3.200000e+01 : f32
    %10 = vector.broadcast %cst_3 : f32 to vector<8x1xf32>
    %11 = arith.divf %9, %10 : vector<8x1xf32>
    %cst_4 = arith.constant 9.99999974E-6 : f32
    %12 = vector.broadcast %cst_4 : f32 to vector<8x1xf32>
    %13 = arith.addf %11, %12 : vector<8x1xf32>
    %14 = math.rsqrt %13 : vector<8x1xf32>
    %15 = vector.broadcast %14 : vector<8x1xf32> to vector<8x32xf32>
    %16 = arith.mulf %6, %15 : vector<8x32xf32>
    %c0_5 = arith.constant 0 : index
    %c0_6 = arith.constant 0 : index
    %17 = vector.load %arg2[%c0_5, %c0_6] : memref<1x32xf32, #tpu.memory_space<vmem>>, vector<1x32xf32>
    %18 = vector.broadcast %17 : vector<1x32xf32> to vector<8x32xf32>
    %19 = arith.mulf %16, %18 : vector<8x32xf32>
    %c0_7 = arith.constant 0 : index
    %c0_8 = arith.constant 0 : index
    %20 = vector.load %arg3[%c0_7, %c0_8] : memref<1x32xf32, #tpu.memory_space<vmem>>, vector<1x32xf32>
    %21 = vector.broadcast %20 : vector<1x32xf32> to vector<8x32xf32>
    %22 = arith.addf %19, %21 : vector<8x32xf32>
    %c0_9 = arith.constant 0 : index
    %c0_10 = arith.constant 0 : index
    %23 = vector.load %arg4[%c0_9, %c0_10] : memref<32x32xf32, #tpu.memory_space<vmem>>, vector<32x32xf32>
    %cst_11 = arith.constant dense<0.000000e+00> : vector<8x32xf32>
    %24 = tpu.matmul %22, %23, %cst_11 {dimension_numbers = #tpu.dot_dimension_numbers<[1], [0], [0], [1], [0, 0, 1, 1], [], []>} : vector<8x32xf32>, vector<32x32xf32>, vector<8x32xf32> -> vector<8x32xf32>
    %c0_12 = arith.constant 0 : index
    %c0_13 = arith.constant 0 : index
    %25 = vector.load %arg5[%c0_12, %c0_13] : memref<1x32xf32, #tpu.memory_space<vmem>>, vector<1x32xf32>
    %26 = vector.broadcast %25 : vector<1x32xf32> to vector<8x32xf32>
    %27 = arith.addf %24, %26 : vector<8x32xf32>
    %c0_14 = arith.constant 0 : index
    %c0_15 = arith.constant 0 : index
    %28 = vector.load %arg6[%c0_14, %c0_15] : memref<8x32xf32, #tpu.memory_space<vmem>>, vector<8x32xf32>
    tpu.vector_store %arg6[%c0_14, %c0_15], %27 {strides = array<i32>} : memref<8x32xf32, #tpu.memory_space<vmem>>, vector<8x32xf32>,
    return
  }
  func.func @transform_0(%arg0: i32) -> (i32, i32) {
    %c0_i32 = arith.constant 0 : i32
    %c0_i32_0 = arith.constant 0 : i32
    return %arg0, %c0_i32 : i32, i32
  }
  func.func @transform_1(%arg0: i32) -> (i32, i32) {
    %c0_i32 = arith.constant 0 : i32
    %c0_i32_0 = arith.constant 0 : i32
    %c0_i32_1 = arith.constant 0 : i32
    return %c0_i32, %c0_i32_0 : i32, i32
  }
  func.func @transform_2(%arg0: i32) -> (i32, i32) {
    %c0_i32 = arith.constant 0 : i32
    %c0_i32_0 = arith.constant 0 : i32
    %c0_i32_1 = arith.constant 0 : i32
    return %c0_i32, %c0_i32_0 : i32, i32
  }
  func.func @transform_3(%arg0: i32) -> (i32, i32) {
    %c0_i32 = arith.constant 0 : i32
    %c0_i32_0 = arith.constant 0 : i32
    %c0_i32_1 = arith.constant 0 : i32
    return %c0_i32, %c0_i32_0 : i32, i32
  }
  func.func @transform_4(%arg0: i32) -> (i32, i32) {
    %c0_i32 = arith.constant 0 : i32
    %c0_i32_0 = arith.constant 0 : i32
    %c0_i32_1 = arith.constant 0 : i32
    return %c0_i32, %c0_i32_0 : i32, i32
  }
  func.func @transform_5(%arg0: i32) -> (i32, i32) {
    %c0_i32 = arith.constant 0 : i32
    %c0_i32_0 = arith.constant 0 : i32
    return %arg0, %c0_i32 : i32, i32
  }
}

</mosaic_0001>

<bundles_post_ra>
// kernel: tpu_custom_call.1
= control target key start
LH: loop header
LB: loop body
LE: loop exit
PB: predicated region body
PF: predicated region fallthrough
CT: control target
= control target key end

     0   :  { %10 = vsyncpa [#allocation3], 0  ;;  %s951_s0 = inlined_call_operand.hbm [shape: f32[16,32], index: 0, kind: input, shape index: {}]   ;;  %s952_s1 = inlined_call_operand.vmem [shape: f32[1,32], index: 1, kind: input, shape index: {}]   ;;  %s953_s2 = inlined_call_operand.vmem [shape: f32[1,32], index: 2, kind: input, shape index: {}]   ;;  %s954_s3 = inlined_call_operand.hbm [shape: f32[32,32], index: 3, kind: input, shape index: {}]   ;;  %s955_s4 = inlined_call_operand.vmem [shape: f32[1,32], index: 4, kind: input, shape index: {}]   ;;  %s956_s5 = inlined_call_operand.hbm [shape: f32[16,32], index: 5, kind: output, shape index: {}]  }
   0x1   :  { %12 = vsyncpa [#allocation3 + $0x1], 0 }
   0x2   :  { %13 = vsyncpa [#allocation6], 0 }
   0x3   :  { %14 = vsyncpa [#allocation4], 0 }
   0x4   :  { %16 = vsyncpa [#allocation4 + $0x1], 0  ;;  %s738_s18 = smov 0   ;;  %s740_s19 = smov 0  }
   0x5   :  { %s742_s20 = smov 0   ;;  %s744_s21 = smov 0  }
   0x6 LB: > { %s759_s22 = sadd.s32 4294967295, %s698_s21   ;;  %s466_s23 = sadd.s32 4294967294, %s698_s21   ;;  %s698_s21 = sphi %s744_s21, %s976_s21   ;;  %s694_s20 = sphi %s742_s20, %s975_s20   ;;  %s690_s19 = sphi %s740_s19, %s974_s19   ;;  %s686_s18 = sphi %s738_s18, %s973_s18  }
   0x7   : > { %p42_p0 = scmp.ne.s32.totalorder %s690_s19, %s686_s18  ;;  %p957_p1 = scmp.eq.s32.totalorder %s759_s22, 0 }
   0x8   : > { %p156_p3 = scmp.eq.s32.totalorder %s466_s23, 1  ;;  %p467_p5 = scmp.ge.s32.totalorder %s698_s21, 1 }
   0x9   : > { %p768_p4 = por %p957_p1, %p42_p0  ;;  %p163_p7 = scmp.lt.s32.totalorder %s698_s21, 3 }
   0xa   : > { %p773_p6 = por %p156_p3, %p42_p0  ;;  %s700_s27 = smov [#allocation5]  }
   0xb   : > { %s960_s24 = scalar_select %p768_p4, 1, 0 }
   0xc   : > { %s961_s25 = scalar_select %p773_p6, 1, 0 }
   0xd   : > { %p778_p8 = pnand %p467_p5, %p163_p7  ;;  %s181_s28 = sshll.u32 %s700_s27, 4  ;;  %s782_s28 = int_to_ptr.vmem [resolvable:$true] %s181_s28 }
   0xe   : > { %s794_s30 = sadd.s32 1, %s698_s21   ;;  %s29_s6 = sadd.s32 1, %s694_s20 }
   0xf   : > { %s962_s26 = scalar_select %p778_p8, 1, 0 }
  0x10   : > { %p514_p9 = pneg %p778_p8  ;;  %s26_s7 = ssub.s32 %s698_s21, %s794_s30 }
  0x11   : > { %s570_s10 = scalar_lea.hbm %s954_s3, 512 }
  0x12   : > { %p789_p11 = pnand %p514_p9, %p957_p1  ;;  %p571_p12 = scmp.ne.s32.totalorder %s954_s3, %s570_s10 }
  0x13   : > { %p577_p5 = scmp.lt.u32.totalorder %s570_s10, %s954_s3 }
  0x14   : > { %p572_p13 = pneg %p789_p11 }
  0x16   : > { %p573_p0 = pnand %p572_p13, %p571_p12 }
  0x18   : > { %p574_p3 = pneg %p573_p0 }
  0x1a   : > { %p579_p7 = pnand %p577_p5, %p574_p3 }
  0x1c   : > { %582 = shalt.err (!%p579_p7)
}
  0x1d   : > { %s583_s15 = scalar_lea.vmem %s782_s28, 512  ;;  %p591_p2 = scmp.lt.s32.totalorder %s782_s28, %s782_s28 }
  0x1e   : > { %p584_p9 = scmp.ne.s32.totalorder %s782_s28, %s583_s15  ;;  %p592_p6 = scmp.lt.s32.totalorder %s583_s15, %s583_s15 }
  0x20   : > { %p586_p10 = pnand %p584_p9, %p572_p13  ;;  %p593_p4 = por %p592_p6, %p591_p2 }
  0x22   : > { %p587_p1 = pneg %p586_p10 }
  0x24   : > { %p594_p8 = pnand %p593_p4, %p587_p1 }
  0x26   : > { %597 = shalt.err (!%p594_p8)
}
  0x27   : > { %s701_s16 = smov 128   ;;  %s702_s17 = smov 8  }
  0x28   : > { %517 = dma.hbm_to_vmem [thread:$0]  (!%p789_p11), %s954_s3, 512, %s782_s28, [#allocation6], %s701_s16, %s701_s16, %s702_s17  }
  0x29   : > { %p27_p2 = scmp.eq.s32.totalorder %s26_s7, 0  ;;  %p36_p1 = scmp.ne.s32.totalorder %s694_s20, %s690_s19 }
  0x2a   : > { %p37_p4 = scmp.eq.s32.totalorder %s698_s21, 0  ;;  %p527_p6 = scmp.lt.s32.totalorder %s698_s21, 2 }
  0x2b   : > { %s825_s8 = scalar_select %p27_p2, %s694_s20, %s29_s6  }
  0x2c   : > { %p38_p8 = por %p37_p4, %p36_p1  ;;  %p964_p10 = scmp.eq.s32.totalorder %s759_s22, 1 }
  0x2d   : > { %s198_s10 = sand.u32 1, %s694_s20   ;;  %s471_s11 = sshll.u32 %s698_s21, 7 }
  0x2e   : > { %p829_p12 = por %p964_p10, %p36_p1  ;;  %s470_s12 = sshll.u32 %s198_s10, 3 }
  0x2f   : > { %s838_s14 = scalar_lea.hbm %s951_s0, %s471_s11  ;;  %s202_s28 = scalar_lea.vmem [#allocation2], %s470_s12 }
  0x30   : > { %s209_s6 = sshll.u32 %s202_s28, 4  ;;  %p840_p11 = pnand %p527_p6, %p38_p8  ;;  %s844_s6 = int_to_ptr.vmem [resolvable:$true] %s209_s6 }
  0x31   : > { %s199_s15 = scalar_lea.sflag [#allocation3], %s198_s10  ;;  %s598_s16 = scalar_lea.hbm %s838_s14, 128 }
  0x32   : > { %p599_p13 = scmp.ne.s32.totalorder %s838_s14, %s598_s16  ;;  %p600_p0 = pneg %p840_p11 }
  0x33   : > { %s603_s27 = scalar_lea.hbm %s951_s0, 256  ;;  %p604_p7 = scmp.lt.u32.totalorder %s838_s14, %s951_s0 }
  0x34   : > { %p601_p3 = pnand %p600_p0, %p599_p13  ;;  %p605_p9 = scmp.lt.u32.totalorder %s603_s27, %s598_s16 }
  0x35   : > { %p607_p1 = scmp.lt.u32.totalorder %s598_s16, %s838_s14 }
  0x36   : > { %p602_p5 = pneg %p601_p3  ;;  %p606_p2 = por %p605_p9, %p604_p7 }
  0x38   : > { %p608_p4 = por %p607_p1, %p606_p2 }
  0x3a   : > { %p609_p6 = pnand %p608_p4, %p602_p5 }
  0x3c   : > { %612 = shalt.err (!%p609_p6)
}
  0x3d   : > { %s613_s10 = scalar_lea.vmem %s844_s6, 128  ;;  %s703_s29 = smov [#allocation2]  }
  0x3e   : > { %p614_p8 = scmp.ne.s32.totalorder %s844_s6, %s613_s10  ;;  %s618_s13 = sshll.u32 %s703_s29, 4  ;;  %s619_s13 = int_to_ptr.vmem [resolvable:$false] %s618_s13 }
  0x3f   : > { %s620_s28 = scalar_lea.vmem %s619_s13, 256  ;;  %p621_p3 = scmp.lt.s32.totalorder %s844_s6, %s619_s13 }
  0x40   : > { %p616_p10 = pnand %p614_p8, %p600_p0  ;;  %p622_p7 = scmp.lt.s32.totalorder %s620_s28, %s613_s10 }
  0x42   : > { %p617_p13 = pneg %p616_p10  ;;  %p623_p9 = por %p622_p7, %p621_p3 }
  0x44   : > { %p624_p2 = pnand %p623_p9, %p617_p13 }
  0x46   : > { %627 = shalt.err (!%p624_p2)
}
  0x47   : > { %521 = dma.hbm_to_vmem [thread:$0]  (!%p840_p11), %s838_s14, 128, %s844_s6, %s199_s15  }
  0x48   : > { %p967_p5 = scmp.ne.s32.totalorder %s962_s26, 0 }
  0x49   : > { %s874_s16 = sand.u32 (!%p967_p5), 1, %s690_s19   ;;  %p968_p0 = scmp.ne.s32.totalorder (!%p967_p5), %s960_s24, 0 }
  0x4a   : > { %218 = sbr.rel (%p967_p5) target bundleno = 627 (0x273), region = 40  ;;  %s473_s17 = sshll.u32 (!%p967_p5), %s874_s16, 3 }
  0x4b   : > { %s221_s23 = scalar_lea.sflag (!%p967_p5), [#allocation3], %s874_s16  ;;  %s224_s27 = scalar_lea.vmem (!%p967_p5), [#allocation2], %s473_s17 }
  0x51   : > { %673 = dma.done.wait (%p968_p0), %s221_s23, 128  }
  0x52   : > { %675 = vsyncadd (%p968_p0), %s221_s23, 4294967168  ;;  %p969_p11 = scmp.eq.s32.totalorder %s759_s22, 0 }
  0x54   : > { %677 = dma.done.wait (%p969_p11), [#allocation6], 512   ;;  %p970_p1 = pmov %p969_p11 }
  0x55   : > { %vm256_vm0 = vcmask 261120   ;;  %v255_v0 = vld [vmem:[%s224_s27] sm:$0xff]  ;;  %v287_v7 = vld [vmem:[#allocation5] sm:$0xff]  ;;  %v288_v8 = vld [vmem:[#allocation5 + $0x8] sm:$0xff]  ;;  %v704_v10 = vmov 0.0|0.0   ;;  %vm705_vm1 = vmmov 0  }
  0x56   : > { %679 = vsyncadd (%p970_p1), [#allocation6], 4294966784  ;;  %v257_v1 = vsel %vm256_vm0, %v255_v0, 0.0  ;;  %v289_v9 = vld [vmem:[#allocation5 + $0x10] sm:$0xff]  ;;  %500 = vmatprep.subr.bf16.mxu0 %v704_v10  ;;  %v501_v11 = vpack.c.bf16 %v288_v8, %v287_v7  ;;  %v290_v12 = vld [vmem:[#allocation5 + $0x18] sm:$0xff]  ;;  %v706_v13 = vmov 0.0  }
  0x57   : > { %258 = vadd.xlane.f32.xlu0 %v257_v1  ;;  %497 = vmatprep.mubr.msk.f32.mxu0 %vm705_vm1, %v706_v13  ;;  %v504_v14 = vpack.c.bf16 %v290_v12, %v289_v9  ;;  %v476_v19 = vld [vmem:[%s952_s1] ss:$0 sm:$0xff]  ;;  %s481_s11 = sshll.u32 %s759_s22, 7  ;;  %s254_s12 = scalar_lea.vmem [#allocation7], %s473_s17 }
  0x58   : > { %502 = vmatpush3.bf16.msra.mxu0 %v501_v11  ;;  %v477_v21 = vld [vmem:[%s953_s2] ss:$0 sm:$0xff]  ;;  %s386_s10 = sshll.u32 %s254_s12, 4  ;;  %s906_s28 = scalar_lea.hbm %s956_s5, %s481_s11  ;;  %s908_s10 = int_to_ptr.vmem [resolvable:$true] %s386_s10 }
  0x59   : > { %503 = vmatprep.subr.bf16.mxu0 %v704_v10  ;;  %v478_v24 = vld [vmem:[%s955_s4] ss:$0 sm:$0xff]  ;;  %s373_s23 = scalar_lea.sflag [#allocation4], %s874_s16  ;;  %s628_s22 = scalar_lea.vmem %s908_s10, 128 }
  0x5a   : > { %p629_p4 = scmp.ne.s32.totalorder %s908_s10, %s628_s22  ;;  %s707_s17 = smov [#allocation7]  }
  0x5b   : > { %s632_s27 = sshll.u32 %s707_s17, 4  ;;  %s633_s27 = int_to_ptr.vmem [resolvable:$false] %s632_s27 }
  0x5c   : > { %505 = vmatpush3.bf16.msra.mxu0 %v504_v14  ;;  %p630_p6 = pnand %p629_p4, %p829_p12  ;;  %s634_s24 = scalar_lea.vmem %s633_s27, 256 }
  0x5d   : > { %p635_p10 = scmp.lt.s32.totalorder %s908_s10, %s633_s27  ;;  %p636_p13 = scmp.lt.s32.totalorder %s634_s24, %s628_s22 }
  0x5e   : > { %p631_p8 = pneg %p630_p6 }
  0x5f   : > { %p637_p3 = por %p636_p13, %p635_p10 }
  0x61   : > { %p638_p7 = pnand %p637_p3, %p631_p8 }
  0xe4   : > { %v259_v2 = vpop.xlane.xlu0 %258 }
  0xe5   : > { %v261_v3 = vmul.f32 0.03125, %v259_v2 }
  0xe7   : > { %v262_v4 = vsub.f32 %v255_v0, %v261_v3 }
  0xe9   : > { %v263_v5 = vmul.f32 %v262_v4, %v262_v4 }
  0xeb   : > { %v264_v6 = vsel %vm256_vm0, %v263_v5, 0.0 }
  0xec   : > { %265 = vadd.xlane.f32.xlu0 %v264_v6 }
 0x179   : > { %v266_v15 = vpop.xlane.xlu0 %265 }
 0x17a   : > { %v267_v16 = vmul.f32 0.03125, %v266_v15 }
 0x17c   : > { %v268_v17 = vadd.f32 1e-05, %v267_v16 }
 0x17e   : > { %568 = vrsqrt.f32 %v268_v17 }
 0x188   : > { %v569_v18 = vpop.eup %568 }
 0x189   : > { %v270_v20 = vmul.f32 %v569_v18, %v262_v4 }
 0x18b   : > { %v278_v22 = vmul.f32 %v476_v19, %v270_v20 }
 0x18d   : > { %v286_v23 = vadd.f32 %v477_v21, %v278_v22 }
 0x18f   : > { %498 = vmatmul.mubr.msk.f32.vlgmr.msra.gmra.mrb[0].mxu0 %vm256_vm0, %v286_v23 }
 0x262   : > { %v367_v25 = vpop.f32.mrb[0].mxu0 }
 0x263   : > { %v368_v26 = vadd.f32 %v478_v24, %v367_v25  ;;  %v499_v27 = vpop.f32.mrb[1].mxu0 }
 0x265   : > { %371 = vst.msk [vmem:[%s254_s12] sm:$0xff] %vm256_vm0, %v368_v26 }
 0x266   : > { %641 = shalt.err (!%p638_p7)
}
 0x267   : > { %s642_s16 = scalar_lea.hbm %s906_s28, 128  ;;  %s646_s6 = scalar_lea.hbm %s956_s5, 256 }
 0x268   : > { %p643_p9 = scmp.ne.s32.totalorder %s906_s28, %s642_s16  ;;  %p647_p0 = scmp.lt.u32.totalorder %s906_s28, %s956_s5 }
 0x269   : > { %p648_p11 = scmp.lt.u32.totalorder %s646_s6, %s642_s16  ;;  %p650_p4 = scmp.lt.u32.totalorder %s642_s16, %s906_s28 }
 0x26a   : > { %p644_p2 = pnand %p643_p9, %p829_p12 }
 0x26b   : > { %p649_p1 = por %p648_p11, %p647_p0 }
 0x26c   : > { %p645_p5 = pneg %p644_p2 }
 0x26d   : > { %p651_p6 = por %p650_p4, %p649_p1 }
 0x26f   : > { %p652_p8 = pnand %p651_p6, %p645_p5 }
 0x271   : > { %655 = shalt.err (!%p652_p8)
}
 0x272   : > { %512 = dma.vmem_to_hbm [thread:$0]  (%p829_p12), %s908_s10, 128, %s906_s28, %s373_s23  }
 0x273 PF: > { %s398_s11 = sand.u32 1, %s686_s18   ;;  %p971_p10 = scmp.ne.s32.totalorder %s961_s25, 0 }
 0x274   : > { %p972_p13 = scmp.ge.s32.totalorder %s698_s21, 2  ;;  %s399_s12 = scalar_lea.sflag [#allocation4], %s398_s11 }
 0x276   : > { %p523_p3 = pnand %p972_p13, %p971_p10 }
 0x278   : > { %681 = dma.done.wait (!%p523_p3), %s399_s12, 128  }
 0x279   : > { %683 = vsyncadd (!%p523_p3), %s399_s12, 4294967168  ;;  %p19_p7 = scmp.ge.s32.totalorder %s794_s30, 4   ;;  %s973_s18 = smov %s690_s19 }
 0x27a   : > { %s974_s19 = smov %s694_s20  ;;  %s975_s20 = smov %s825_s8 }
 0x27b   : > { %s976_s21 = smov %s794_s30  ;;  %21 = sbr.rel (!%p19_p7) target bundleno = 6 (0x6), region = 89 }
 0x282   :  { %404 = vsyncpa [#allocation3], 1 }
 0x283   :  { %406 = vsyncpa [#allocation3 + $0x1], 1 }
 0x284   :  { %407 = vsyncpa [#allocation6], 1 }
 0x285   :  { %408 = vsyncpa [#allocation4], 1 }
 0x286   :  { %410 = vsyncpa [#allocation4 + $0x1], 1 }

</bundles_post_ra>
